<compile_context>
chip_gen: v6e
topology: v6e:2x2x1
jax: 0.10.0
libtpu: 0.0.40
codegen_flags: <defaults>
</compile_context>

<pallas_src>
import jax
import jax.numpy as jnp
from jax.experimental import pallas as pl
from jax.experimental.pallas import tpu as pltpu


def _round_up(x, m):
    return ((x + m - 1) // m) * m


def _qlinear_kernel(x_ref, w_ref, b_ref, o_ref, acc_ref):
    """Tiled matmul with f32 VMEM accumulator. Grid axes: (M tiles, N tiles, K tiles);
    K is the reduction axis (last). Bias is folded in on the final K step."""
    @pl.when(pl.program_id(2) == 0)
    def _():
        acc_ref[...] = jnp.zeros_like(acc_ref)

    acc_ref[...] += jnp.dot(x_ref[...], w_ref[...],
                            preferred_element_type=jnp.float32)

    @pl.when(pl.program_id(2) == pl.num_programs(2) - 1)
    def _():
        o_ref[...] = (acc_ref[...] + b_ref[...]).astype(o_ref.dtype)


@jax.jit
def quaternion_linear_pallas(x, r_w, i_w, j_w, k_w, bias):
    """Quaternion linear layer matching QSNLinear / QuaternionLinear forward.

    x              : (..., in_features) float32
    r/i/j/k_w      : (in_features//4, out_features//4) float32
    bias           : (out_features,) float32
    returns        : (..., out_features) float32
    """
    # --- Hamilton-product quaternion weight assembly (layout glue, plain JAX) ---
    col_r = jnp.concatenate([r_w, -i_w, -j_w, -k_w], axis=0)
    col_i = jnp.concatenate([i_w,  r_w, -k_w,  j_w], axis=0)
    col_j = jnp.concatenate([j_w,  k_w,  r_w, -i_w], axis=0)
    col_k = jnp.concatenate([k_w, -j_w,  i_w,  r_w], axis=0)
    w_full = jnp.concatenate([col_r, col_i, col_j, col_k], axis=1)  # (K, N)

    lead = x.shape[:-1]
    K = x.shape[-1]
    N = w_full.shape[1]
    x2 = x.reshape(-1, K)
    M = x2.shape[0]

    # --- tile sizes: big enough to saturate DMA/MXU, small enough for v7x VMEM ---
    tm = min(512, _round_up(M, 8))
    tn = min(256, _round_up(N, 128))
    tk = min(512, _round_up(K, 128))
    Mp, Np, Kp = _round_up(M, tm), _round_up(N, tn), _round_up(K, tk)

    # bf16 inputs (f32 accumulation in-kernel); zero-padding contributes nothing.
    x_p = jnp.pad(x2.astype(jnp.bfloat16), ((0, Mp - M), (0, Kp - K)))
    w_p = jnp.pad(w_full.astype(jnp.bfloat16), ((0, Kp - K), (0, Np - N)))
    b_p = jnp.pad(bias.astype(jnp.float32), (0, Np - N)).reshape(1, Np)

    grid = (Mp // tm, Np // tn, Kp // tk)
    out_p = pl.pallas_call(
        _qlinear_kernel,
        out_shape=jax.ShapeDtypeStruct((Mp, Np), jnp.float32),
        grid=grid,
        in_specs=[
            pl.BlockSpec((tm, tk), lambda i, j, k: (i, k)),
            pl.BlockSpec((tk, tn), lambda i, j, k: (k, j)),
            pl.BlockSpec((1, tn), lambda i, j, k: (0, j)),
        ],
        out_specs=pl.BlockSpec((tm, tn), lambda i, j, k: (i, j)),
        scratch_shapes=[pltpu.VMEM((tm, tn), jnp.float32)],
        compiler_params=pltpu.CompilerParams(
            dimension_semantics=("parallel", "parallel", "arbitrary")),
    )(x_p, w_p, b_p)

    return out_p[:M, :N].reshape(*lead, N)


if __name__ == "__main__":
    key = jax.random.PRNGKey(0)
    kx, kr, ki, kj, kk = jax.random.split(key, 5)

    # Small shapes consistent with the module (in/out features divisible by 4).
    batch, seq, in_features, out_features = 2, 8, 32, 32

    x = jax.random.normal(kx, (batch, seq, in_features), jnp.float32)
    wshape = (in_features // 4, out_features // 4)
    # torch.nn.init.normal_(std=0.02) equivalents, deterministic via PRNGKey(0).
    r_w = 0.02 * jax.random.normal(kr, wshape, jnp.float32)
    i_w = 0.02 * jax.random.normal(ki, wshape, jnp.float32)
    j_w = 0.02 * jax.random.normal(kj, wshape, jnp.float32)
    k_w = 0.02 * jax.random.normal(kk, wshape, jnp.float32)
    bias = jnp.zeros((out_features,), jnp.float32)  # QuaternionLinear default bias init: zeros

    out = quaternion_linear_pallas(x, r_w, i_w, j_w, k_w, bias)
    out = jax.block_until_ready(out)
    assert out.shape == (batch, seq, out_features), out.shape

    # Reference check (f32 matmul with the same Hamilton weight construction).
    col_r = jnp.concatenate([r_w, -i_w, -j_w, -k_w], axis=0)
    col_i = jnp.concatenate([i_w,  r_w, -k_w,  j_w], axis=0)
    col_j = jnp.concatenate([j_w,  k_w,  r_w, -i_w], axis=0)
    col_k = jnp.concatenate([k_w, -j_w,  i_w,  r_w], axis=0)
    w_full = jnp.concatenate([col_r, col_i, col_j, col_k], axis=1)
    ref = jnp.einsum("bsk,kn->bsn", x, w_full) + bias.reshape(1, 1, out_features)

    # Tolerance loosened for bf16 kernel inputs (accumulation is f32).
    assert jnp.allclose(out, ref, atol=1e-2, rtol=1e-2), float(jnp.max(jnp.abs(out - ref)))

    print("KERNEL_OK")
</pallas_src>

<mosaic_0001>
module attributes {stable_mosaic.version = 11 : i64} {
  func.func @_qlinear_kernel(%arg0: i32, %arg1: i32, %arg2: i32, %arg3: memref<16x128xbf16, #tpu.memory_space<vmem>>, %arg4: memref<128x128xbf16, #tpu.memory_space<vmem>>, %arg5: memref<1x128xf32, #tpu.memory_space<vmem>>, %arg6: memref<16x128xf32, #tpu.memory_space<vmem>>, %arg7: memref<16x128xf32, #tpu.memory_space<vmem>>) attributes {dimension_semantics = [#tpu.dimension_semantics<parallel>, #tpu.dimension_semantics<parallel>, #tpu.dimension_semantics<arbitrary>], iteration_bounds = array<i64: 1, 1, 1>, scalar_prefetch = 0 : i64, scratch_operands = 1 : i64, tpu.core_type = #tpu.core_type<tc>, window_params = [{transform_indices = @transform_0, window_bounds = array<i64: 16, 128>}, {transform_indices = @transform_1, window_bounds = array<i64: 128, 128>}, {transform_indices = @transform_2, window_bounds = array<i64: 1, 128>}, {transform_indices = @transform_3, window_bounds = array<i64: 16, 128>}]} {
    %c0_i32 = arith.constant 0 : i32
    %0 = arith.cmpi eq, %arg2, %c0_i32 : i32
    %1 = arith.extui %0 : i1 to i32
    %c0_i32_0 = arith.constant 0 : i32
    %2 = arith.cmpi ne, %1, %c0_i32_0 : i32
    scf.if %2 {
      %cst_10 = arith.constant 0.000000e+00 : f32
      %12 = vector.broadcast %cst_10 : f32 to vector<16x128xf32>
      %c0_11 = arith.constant 0 : index
      %c0_12 = arith.constant 0 : index
      %13 = vector.load %arg7[%c0_11, %c0_12] : memref<16x128xf32, #tpu.memory_space<vmem>>, vector<16x128xf32>
      tpu.vector_store %arg7[%c0_11, %c0_12], %12 {strides = array<i32>} : memref<16x128xf32, #tpu.memory_space<vmem>>, vector<16x128xf32>,
    } else {
    }
    %c0 = arith.constant 0 : index
    %c0_1 = arith.constant 0 : index
    %3 = vector.load %arg7[%c0, %c0_1] : memref<16x128xf32, #tpu.memory_space<vmem>>, vector<16x128xf32>
    %c0_2 = arith.constant 0 : index
    %c0_3 = arith.constant 0 : index
    %4 = vector.load %arg3[%c0_2, %c0_3] : memref<16x128xbf16, #tpu.memory_space<vmem>>, vector<16x128xbf16>
    %c0_4 = arith.constant 0 : index
    %c0_5 = arith.constant 0 : index
    %5 = vector.load %arg4[%c0_4, %c0_5] : memref<128x128xbf16, #tpu.memory_space<vmem>>, vector<128x128xbf16>
    %cst = arith.constant dense<0.000000e+00> : vector<16x128xf32>
    %6 = tpu.matmul %4, %5, %cst {dimension_numbers = #tpu.dot_dimension_numbers<[1], [0], [0], [1], [0, 0, 1, 1], [], []>} : vector<16x128xbf16>, vector<128x128xbf16>, vector<16x128xf32> -> vector<16x128xf32>
    %7 = arith.addf %3, %6 : vector<16x128xf32>
    %c0_6 = arith.constant 0 : index
    %c0_7 = arith.constant 0 : index
    %8 = vector.load %arg7[%c0_6, %c0_7] : memref<16x128xf32, #tpu.memory_space<vmem>>, vector<16x128xf32>
    tpu.vector_store %arg7[%c0_6, %c0_7], %7 {strides = array<i32>} : memref<16x128xf32, #tpu.memory_space<vmem>>, vector<16x128xf32>,
    %c0_i32_8 = arith.constant 0 : i32
    %9 = arith.cmpi eq, %arg2, %c0_i32_8 : i32
    %10 = arith.extui %9 : i1 to i32
    %c0_i32_9 = arith.constant 0 : i32
    %11 = arith.cmpi ne, %10, %c0_i32_9 : i32
    scf.if %11 {
      %c0_10 = arith.constant 0 : index
      %c0_11 = arith.constant 0 : index
      %12 = vector.load %arg7[%c0_10, %c0_11] : memref<16x128xf32, #tpu.memory_space<vmem>>, vector<16x128xf32>
      %c0_12 = arith.constant 0 : index
      %c0_13 = arith.constant 0 : index
      %13 = vector.load %arg5[%c0_12, %c0_13] : memref<1x128xf32, #tpu.memory_space<vmem>>, vector<1x128xf32>
      %14 = vector.broadcast %13 : vector<1x128xf32> to vector<16x128xf32>
      %15 = arith.addf %12, %14 : vector<16x128xf32>
      %c0_14 = arith.constant 0 : index
      %c0_15 = arith.constant 0 : index
      %16 = vector.load %arg6[%c0_14, %c0_15] : memref<16x128xf32, #tpu.memory_space<vmem>>, vector<16x128xf32>
      tpu.vector_store %arg6[%c0_14, %c0_15], %15 {strides = array<i32>} : memref<16x128xf32, #tpu.memory_space<vmem>>, vector<16x128xf32>,
    } else {
    }
    return
  }
  func.func @transform_0(%arg0: i32, %arg1: i32, %arg2: i32) -> (i32, i32) {
    %c0_i32 = arith.constant 0 : i32
    return %arg0, %arg2 : i32, i32
  }
  func.func @transform_1(%arg0: i32, %arg1: i32, %arg2: i32) -> (i32, i32) {
    %c0_i32 = arith.constant 0 : i32
    return %arg2, %arg1 : i32, i32
  }
  func.func @transform_2(%arg0: i32, %arg1: i32, %arg2: i32) -> (i32, i32) {
    %c0_i32 = arith.constant 0 : i32
    %c0_i32_0 = arith.constant 0 : i32
    return %c0_i32, %arg1 : i32, i32
  }
  func.func @transform_3(%arg0: i32, %arg1: i32, %arg2: i32) -> (i32, i32) {
    %c0_i32 = arith.constant 0 : i32
    return %arg0, %arg1 : i32, i32
  }
}

</mosaic_0001>

<bundles_post_ra>
// kernel: quaternion_linear_pallas.1
= control target key start
LH: loop header
LB: loop body
LE: loop exit
PB: predicated region body
PF: predicated region fallthrough
CT: control target
= control target key end

     0   :  { %v210_v0 = vmov 0.0   ;;  %vm211_vm0 = vmmov 0   ;;  %s268_s1 = inlined_call_operand.vmem [shape: bf16[128,128], index: 1, kind: input, shape index: {}]   ;;  %s269_s0 = inlined_call_operand.vmem [shape: bf16[16,128], index: 0, kind: input, shape index: {}]   ;;  %s270_s2 = inlined_call_operand.vmem [shape: f32[1,128], index: 2, kind: input, shape index: {}]   ;;  %s271_s3 = inlined_call_operand.vmem [shape: f32[16,128], index: 3, kind: output, shape index: {}]  }
   0x1   :  { %179 = vmatprep.subr.bf16.mxu0 %v210_v0  ;;  %v201_v1 = vld [vmem:[%s268_s1 + $0x38] sm:$0xff]   ;;  %195 = vmatprep.mubr.msk.bf16.mxu0 %vm211_vm0, %v210_v0  ;;  %v202_v2 = vld [vmem:[%s268_s1 + $0x30] sm:$0xff]   ;;  %v203_v3 = vld [vmem:[%s268_s1 + $0x28] sm:$0xff]  }
   0x2   :  { %180 = vmatpush3.bf16.msra.mxu0 %v201_v1  ;;  %v204_v4 = vld [vmem:[%s268_s1 + $0x20] sm:$0xff]   ;;  %v205_v5 = vld [vmem:[%s268_s1 + $0x18] sm:$0xff]   ;;  %v206_v6 = vld [vmem:[%s268_s1 + $0x10] sm:$0xff]  }
   0x3   :  { %181 = vmatprep.subr.bf16.mxu0 %v210_v0  ;;  %v207_v7 = vld [vmem:[%s268_s1 + $0x8] sm:$0xff]   ;;  %v208_v8 = vld [vmem:[%s268_s1] sm:$0xff]  }
   0x4   :  { %v209_v9 = vld [vmem:[%s269_s0] sm:$0xff]  }
   0x5   :  { %v169_v10 = vld [vmem:[%s270_s2] ss:$0 sm:$0xff] }
   0x6   :  { %182 = vmatpush3.bf16.msra.mxu0 %v202_v2 }
   0x7   :  { %183 = vmatprep.subr.bf16.mxu0 %v210_v0 }
   0xa   :  { %184 = vmatpush3.bf16.msra.mxu0 %v203_v3 }
   0xb   :  { %185 = vmatprep.subr.bf16.mxu0 %v210_v0 }
   0xe   :  { %186 = vmatpush3.bf16.msra.mxu0 %v204_v4 }
   0xf   :  { %187 = vmatprep.subr.bf16.mxu0 %v210_v0 }
  0x12   :  { %188 = vmatpush3.bf16.msra.mxu0 %v205_v5 }
  0x13   :  { %189 = vmatprep.subr.bf16.mxu0 %v210_v0 }
  0x16   :  { %190 = vmatpush3.bf16.msra.mxu0 %v206_v6 }
  0x17   :  { %191 = vmatprep.subr.bf16.mxu0 %v210_v0 }
  0x1a   :  { %192 = vmatpush3.bf16.msra.mxu0 %v207_v7 }
  0x1b   :  { %193 = vmatprep.subr.bf16.mxu0 %v210_v0 }
  0x1e   :  { %194 = vmatpush3.bf16.msra.mxu0 %v208_v8 }
  0x21   :  { %196 = vmatmul.mubr.bf16.vlgmr.msra.gmra.mxu0 %v209_v9 }
  0xe1   :  { %v129_v11 = vpop.f32.mrf.mxu0 }
  0xe2   :  { %v152_v12 = vadd.f32 %v169_v10, %v129_v11 }
  0xe3   :  { %v197_v13 = vpop.f32.mrf.mxu0 }
  0xe4   :  { %154 = vst [vmem:[%s271_s3] sm:$0xff] %v152_v12 }
  0xe5   :  { %v132_v14 = vpop.f32.mrf.mxu0 }
  0xe6   :  { %v153_v15 = vadd.f32 %v169_v10, %v132_v14 }
  0xe7   :  { %v198_v16 = vpop.f32.mrf.mxu0 }
  0xe8   :  { %155 = vst [vmem:[%s271_s3 + $0x8] sm:$0xff] %v153_v15 }

</bundles_post_ra>
